<compile_context>
chip_gen: v5e
topology: v5e:2x2
jax: 0.10.0
libtpu: 0.0.40
codegen_flags: <defaults>
</compile_context>

<pallas_src>
import functools

import jax
import jax.numpy as jnp
from jax.experimental import pallas as pl
from jax.experimental.pallas import tpu as pltpu

_SQRT_2_OVER_PI = 0.7978845608028654


def _tanh_gelu(g):
    # TODO(synk): torch.nn.functional.gelu defaults to the exact erf form; the
    # tanh approximation (max abs diff ~3e-3) is used for guaranteed Mosaic
    # lowering (tanh maps to the EUP slot).
    return 0.5 * g * (1.0 + jnp.tanh(_SQRT_2_OVER_PI * (g + 0.044715 * g * g * g)))


def _geglu_ff_kernel(x_ref, w1_ref, b1_ref, w2_ref, b2_ref, o_ref, acc_ref):
    """One (tm, D_p) row tile x one hidden tile of the GEGLU feed-forward."""
    j = pl.program_id(1)
    th = w2_ref.shape[0]  # static hidden-tile width (multiple of 128)

    x = x_ref[...]  # already bf16 (cast fused into the wrapper-side pad)

    # Single merged first-projection dot; tile columns are laid out [a_j | g_j].
    h = jnp.dot(x, w1_ref[...], preferred_element_type=jnp.float32) + b1_ref[...]
    a = h[:, :th]
    g = h[:, th:]

    # GEGLU gating in f32.  Dropout(p=0.0) is the identity.
    z = (a * _tanh_gelu(g)).astype(jnp.bfloat16)

    partial = jnp.dot(z, w2_ref[...], preferred_element_type=jnp.float32)

    @pl.when(j == 0)
    def _():
        acc_ref[...] = partial

    @pl.when(j > 0)
    def _():
        acc_ref[...] += partial

    @pl.when(j == pl.num_programs(1) - 1)
    def _():
        o_ref[...] = (acc_ref[...] + b2_ref[...]).astype(o_ref.dtype)


def _round_up(v, m):
    return ((v + m - 1) // m) * m


def _vmem_bytes(tm, d_p, th, nh):
    """Rough VMEM footprint estimate for one tile configuration."""
    wbuf = 1 if nh == 1 else 2                     # resident vs streamed weights
    x_in = 2 * tm * d_p * 2                        # bf16 x tile, double-buffered
    y_out = 2 * tm * d_p * 4                       # f32 out tile, double-buffered
    weights = wbuf * (d_p * (2 * th) + th * d_p) * 2   # bf16 W1 + W2 tiles
    biases = wbuf * (2 * th + d_p) * 4
    acc = tm * d_p * 4                             # f32 accumulator scratch
    temps = 5 * tm * th * 4 + 2 * tm * d_p * 4     # h/a/g/z/partial headroom
    return x_in + y_out + weights + biases + acc + temps


def _plan_bytes(tm, d_p, th, h_p128):
    h_pp = _round_up(h_p128, th)
    nh = h_pp // th
    return _vmem_bytes(tm, d_p, th, nh)


@functools.partial(jax.jit, static_argnames=("row_tile", "hidden_tile"))
def feed_forward(x, w1, b1, w2, b2, *, row_tile=None, hidden_tile=None):
    """FeedForward forward pass.

    x  : (B, S, D)
    w1 : (D, 2*H)  first Linear weight, stored (in, out) (torch weight.T)
    b1 : (2*H,)
    w2 : (H, D)    second Linear weight, stored (in, out) (torch weight.T)
    b2 : (D,)
    """
    B, S, D = x.shape
    two_h = w1.shape[1]
    H = two_h // 2
    assert w1.shape == (D, two_h) and b1.shape == (two_h,)
    assert w2.shape == (H, D) and b2.shape == (D,)

    rows = B * S
    rows8 = _round_up(rows, 8)
    D_p = _round_up(D, 128)      # lane-dense contracted / output dim
    H_p128 = _round_up(H, 128)   # lane-dense hidden dim (before tile rounding)

    # Generation-aware VMEM budget (v5e/v6e: 128 MiB, v7x: 64 MiB per TC).
    try:
        vmem_cap = int(pltpu.get_tpu_info().vmem_capacity_bytes)
    except Exception:
        vmem_cap = 64 * 1024 * 1024  # conservative (v7x) fallback
    budget = (vmem_cap * 3) // 4

    # Row tile: big by default (amortizes ~0.35us/step, full-height MXU LHS),
    # but keep >= 4 grid steps when there is enough work (2 TCs on v7x).
    if row_tile is not None:
        tm = max(8, min(_round_up(row_tile, 8), rows8))
    else:
        tm = min(512, rows8)
        while tm > 256 and (rows8 + tm - 1) // tm < 4:
            tm = _round_up(tm // 2, 8)
        tm = max(8, tm)

    # Hidden tile: fully resident if it fits the budget, otherwise stream W1/W2
    # over an inner "arbitrary" grid axis.  Shrink the hidden tile before the
    # row tile; never drop the row tile below 128 (MXU-utilization floor).
    if hidden_tile is not None:
        th = max(128, min(_round_up(hidden_tile, 128), H_p128))
    else:
        th = H_p128
        while th > 128 and _plan_bytes(tm, D_p, th, H_p128) > budget:
            th = max(128, _round_up(th // 2, 128))
        while tm > 128 and _plan_bytes(tm, D_p, th, H_p128) > budget:
            tm = max(128, _round_up(tm // 2, 8))

    H_pp = _round_up(H_p128, th)     # hidden dim padded to a multiple of th
    nh = H_pp // th
    rows_p = _round_up(rows, tm)
    nr = rows_p // tm
    grid = (nr, nh)

    # --- operand prep (all done ONCE in the wrapper, never per grid step) ---
    # x: pad to lane-dense shape and cast to bf16 (halves the x DMA stream).
    x2d = jnp.pad(x.reshape(rows, D),
                  ((0, rows_p - rows), (0, D_p - D))).astype(jnp.bfloat16)

    # W1 / b1: split GEGLU halves, pad, then re-pack per hidden tile as
    # [a_j | g_j] so each grid step does a single (D_p, 2*th) merged dot.
    w1a = jnp.pad(w1[:, :H], ((0, D_p - D), (0, H_pp - H)))
    w1g = jnp.pad(w1[:, H:], ((0, D_p - D), (0, H_pp - H)))
    w1m = jnp.concatenate(
        [w1a.reshape(D_p, nh, th), w1g.reshape(D_p, nh, th)], axis=2
    ).reshape(D_p, 2 * H_pp).astype(jnp.bfloat16)

    b1a = jnp.pad(b1[:H], (0, H_pp - H)).reshape(nh, th)
    b1g = jnp.pad(b1[H:], (0, H_pp - H)).reshape(nh, th)
    b1m = jnp.concatenate([b1a, b1g], axis=1).reshape(1, 2 * H_pp).astype(jnp.float32)

    w2p = jnp.pad(w2, ((0, H_pp - H), (0, D_p - D))).astype(jnp.bfloat16)
    b2p = jnp.pad(b2, (0, D_p - D)).reshape(1, D_p).astype(jnp.float32)

    # Weight operands: single-buffered when resident (nh == 1), default
    # double-buffered when streamed across the hidden axis.
    def _wspec(shape, idx):
        if nh == 1:
            return pl.BlockSpec(shape, idx, pipeline_mode=pl.Buffered(1))
        return pl.BlockSpec(shape, idx)

    out_itemsize = jnp.dtype(x.dtype).itemsize
    weight_passes = 1 if nh == 1 else nr
    cost = pl.CostEstimate(
        flops=int(6 * rows_p * D_p * H_pp),            # 2*r*D*(2H) + 2*r*H*D
        transcendentals=int(rows_p * H_pp),            # one tanh per hidden elem
        bytes_accessed=int(rows_p * D_p * 2                        # bf16 x read
                           + rows_p * D_p * out_itemsize           # y write
                           + weight_passes * 3 * D_p * H_pp * 2    # bf16 weights
                           + (2 * H_pp + D_p) * 4),                # biases
    )

    est = _vmem_bytes(tm, D_p, th, nh)
    vmem_limit = int(min(vmem_cap * 9 // 10,
                         max(32 * 1024 * 1024, est * 5 // 4)))

    out = pl.pallas_call(
        _geglu_ff_kernel,
        out_shape=jax.ShapeDtypeStruct((rows_p, D_p), x.dtype),
        grid=grid,
        in_specs=[
            pl.BlockSpec((tm, D_p), lambda i, j: (i, 0)),            # x rows (bf16)
            _wspec((D_p, 2 * th), lambda i, j: (0, j)),              # W1 tile [a|g]
            _wspec((1, 2 * th), lambda i, j: (0, j)),                # b1 tile [a|g]
            _wspec((th, D_p), lambda i, j: (j, 0)),                  # W2 tile
            pl.BlockSpec((1, D_p), lambda i, j: (0, 0),
                         pipeline_mode=pl.Buffered(1)),              # b2 (invariant)
        ],
        out_specs=pl.BlockSpec((tm, D_p), lambda i, j: (i, 0)),
        scratch_shapes=[pltpu.VMEM((tm, D_p), jnp.float32)],         # y accumulator
        compiler_params=pltpu.CompilerParams(
            dimension_semantics=("parallel", "arbitrary"),
            vmem_limit_bytes=vmem_limit,
        ),
        cost_estimate=cost,
    )(x2d, w1m, b1m, w2p, b2p)

    return out[:rows, :D].reshape(B, S, D)


def _reference(x, w1, b1, w2, b2):
    """Pure-JAX f32 reference (same tanh-GELU formula)."""
    h = x @ w1 + b1
    H = w1.shape[1] // 2
    a, g = h[..., :H], h[..., H:]
    z = a * _tanh_gelu(g)
    return (z @ w2 + b2).astype(x.dtype)


def _make_inputs(key, B, S, D, MULT):
    H = D * MULT
    k_x, k_w1, k_b1, k_w2, k_b2 = jax.random.split(key, 5)
    x = jax.random.normal(k_x, (B, S, D), dtype=jnp.float32)
    # torch nn.Linear default init: U(-1/sqrt(fan_in), 1/sqrt(fan_in)),
    # stored pre-transposed as (in, out).
    bound1 = 1.0 / (D ** 0.5)
    w1 = jax.random.uniform(k_w1, (D, 2 * H), minval=-bound1, maxval=bound1,
                            dtype=jnp.float32)
    b1 = jax.random.uniform(k_b1, (2 * H,), minval=-bound1, maxval=bound1,
                            dtype=jnp.float32)
    bound2 = 1.0 / (H ** 0.5)
    w2 = jax.random.uniform(k_w2, (H, D), minval=-bound2, maxval=bound2,
                            dtype=jnp.float32)
    b2 = jax.random.uniform(k_b2, (D,), minval=-bound2, maxval=bound2,
                            dtype=jnp.float32)
    return x, w1, b1, w2, b2


if __name__ == "__main__":
    key = jax.random.PRNGKey(0)
    k1, k2 = jax.random.split(key)

    # Test 1: resident-weight path (nh == 1).  batch=2, seq=8, dim=32, mult=4.
    x, w1, b1, w2, b2 = _make_inputs(k1, 2, 8, 32, 4)
    out = jax.block_until_ready(feed_forward(x, w1, b1, w2, b2))
    ref = _reference(x, w1, b1, w2, b2)
    assert out.shape == x.shape
    # bf16 MXU inputs with f32 accumulation -> loosened tolerance.
    assert jnp.allclose(out, ref, atol=2e-2, rtol=2e-2), float(
        jnp.max(jnp.abs(out - ref)))

    # Test 2: streamed H-tiled accumulator path (nh == 4 forced via hidden_tile),
    # exercising the large-D fallback.  dim=64, mult=8 -> hidden=512.
    x, w1, b1, w2, b2 = _make_inputs(k2, 2, 8, 64, 8)
    out = jax.block_until_ready(feed_forward(x, w1, b1, w2, b2, hidden_tile=128))
    ref = _reference(x, w1, b1, w2, b2)
    assert out.shape == x.shape
    assert jnp.allclose(out, ref, atol=2e-2, rtol=2e-2), float(
        jnp.max(jnp.abs(out - ref)))

    print("KERNEL_OK")
</pallas_src>

<mosaic_0001>
module attributes {stable_mosaic.version = 11 : i64} {
  func.func @_geglu_ff_kernel(%arg0: i32, %arg1: i32, %arg2: memref<16x128xbf16, #tpu.memory_space<vmem>>, %arg3: memref<128x256xbf16, #tpu.memory_space<vmem>>, %arg4: memref<1x256xf32, #tpu.memory_space<vmem>>, %arg5: memref<128x128xbf16, #tpu.memory_space<vmem>>, %arg6: memref<1x128xf32, #tpu.memory_space<vmem>>, %arg7: memref<16x128xf32, #tpu.memory_space<vmem>>, %arg8: memref<16x128xf32, #tpu.memory_space<vmem>>) attributes {dimension_semantics = [#tpu.dimension_semantics<parallel>, #tpu.dimension_semantics<arbitrary>], iteration_bounds = array<i64: 1, 1>, scalar_prefetch = 0 : i64, scratch_operands = 1 : i64, tpu.core_type = #tpu.core_type<tc>, window_params = [{transform_indices = @transform_0, window_bounds = array<i64: 16, 128>}, {pipeline_mode = #tpu.pipeline_mode<synchronous>, transform_indices = @transform_1, window_bounds = array<i64: 128, 256>}, {pipeline_mode = #tpu.pipeline_mode<synchronous>, transform_indices = @transform_2, window_bounds = array<i64: 1, 256>}, {pipeline_mode = #tpu.pipeline_mode<synchronous>, transform_indices = @transform_3, window_bounds = array<i64: 128, 128>}, {pipeline_mode = #tpu.pipeline_mode<synchronous>, transform_indices = @transform_4, window_bounds = array<i64: 1, 128>}, {transform_indices = @transform_5, window_bounds = array<i64: 16, 128>}]} {
    %c0 = arith.constant 0 : index
    %c0_0 = arith.constant 0 : index
    %0 = vector.load %arg2[%c0, %c0_0] : memref<16x128xbf16, #tpu.memory_space<vmem>>, vector<16x128xbf16>
    %c0_1 = arith.constant 0 : index
    %c0_2 = arith.constant 0 : index
    %1 = vector.load %arg3[%c0_1, %c0_2] : memref<128x256xbf16, #tpu.memory_space<vmem>>, vector<128x256xbf16>
    %cst = arith.constant dense<0.000000e+00> : vector<16x256xf32>
    %2 = tpu.matmul %0, %1, %cst {dimension_numbers = #tpu.dot_dimension_numbers<[1], [0], [0], [1], [0, 0, 1, 1], [], []>} : vector<16x128xbf16>, vector<128x256xbf16>, vector<16x256xf32> -> vector<16x256xf32>
    %c0_3 = arith.constant 0 : index
    %c0_4 = arith.constant 0 : index
    %3 = vector.load %arg4[%c0_3, %c0_4] : memref<1x256xf32, #tpu.memory_space<vmem>>, vector<1x256xf32>
    %4 = vector.broadcast %3 : vector<1x256xf32> to vector<16x256xf32>
    %5 = arith.addf %2, %4 : vector<16x256xf32>
    %6 = vector.extract_strided_slice %5 {offsets = [0, 0], sizes = [16, 128], strides = [1, 1]} : vector<16x256xf32> to vector<16x128xf32>
    %7 = vector.extract_strided_slice %5 {offsets = [0, 128], sizes = [16, 128], strides = [1, 1]} : vector<16x256xf32> to vector<16x128xf32>
    %cst_5 = arith.constant 5.000000e-01 : f32
    %8 = vector.broadcast %cst_5 : f32 to vector<16x128xf32>
    %9 = arith.mulf %8, %7 : vector<16x128xf32>
    %cst_6 = arith.constant 4.471500e-02 : f32
    %10 = vector.broadcast %cst_6 : f32 to vector<16x128xf32>
    %11 = arith.mulf %10, %7 : vector<16x128xf32>
    %12 = arith.mulf %11, %7 : vector<16x128xf32>
    %13 = arith.mulf %12, %7 : vector<16x128xf32>
    %14 = arith.addf %7, %13 : vector<16x128xf32>
    %cst_7 = arith.constant 0.797884583 : f32
    %15 = vector.broadcast %cst_7 : f32 to vector<16x128xf32>
    %16 = arith.mulf %15, %14 : vector<16x128xf32>
    %17 = math.tanh %16 : vector<16x128xf32>
    %cst_8 = arith.constant 1.000000e+00 : f32
    %18 = vector.broadcast %cst_8 : f32 to vector<16x128xf32>
    %19 = arith.addf %18, %17 : vector<16x128xf32>
    %20 = arith.mulf %9, %19 : vector<16x128xf32>
    %21 = arith.mulf %6, %20 : vector<16x128xf32>
    %22 = arith.truncf %21 : vector<16x128xf32> to vector<16x128xbf16>
    %c0_9 = arith.constant 0 : index
    %c0_10 = arith.constant 0 : index
    %23 = vector.load %arg5[%c0_9, %c0_10] : memref<128x128xbf16, #tpu.memory_space<vmem>>, vector<128x128xbf16>
    %cst_11 = arith.constant dense<0.000000e+00> : vector<16x128xf32>
    %24 = tpu.matmul %22, %23, %cst_11 {dimension_numbers = #tpu.dot_dimension_numbers<[1], [0], [0], [1], [0, 0, 1, 1], [], []>} : vector<16x128xbf16>, vector<128x128xbf16>, vector<16x128xf32> -> vector<16x128xf32>
    %c0_i32 = arith.constant 0 : i32
    %25 = arith.cmpi eq, %arg1, %c0_i32 : i32
    %26 = arith.extui %25 : i1 to i32
    %c0_i32_12 = arith.constant 0 : i32
    %27 = arith.cmpi ne, %26, %c0_i32_12 : i32
    scf.if %27 {
      %c0_17 = arith.constant 0 : index
      %c0_18 = arith.constant 0 : index
      %34 = vector.load %arg8[%c0_17, %c0_18] : memref<16x128xf32, #tpu.memory_space<vmem>>, vector<16x128xf32>
      tpu.vector_store %arg8[%c0_17, %c0_18], %24 {strides = array<i32>} : memref<16x128xf32, #tpu.memory_space<vmem>>, vector<16x128xf32>,
    } else {
    }
    %c0_i32_13 = arith.constant 0 : i32
    %28 = arith.cmpi sgt, %arg1, %c0_i32_13 : i32
    %29 = arith.extui %28 : i1 to i32
    %c0_i32_14 = arith.constant 0 : i32
    %30 = arith.cmpi ne, %29, %c0_i32_14 : i32
    scf.if %30 {
      %c0_17 = arith.constant 0 : index
      %c0_18 = arith.constant 0 : index
      %34 = vector.load %arg8[%c0_17, %c0_18] : memref<16x128xf32, #tpu.memory_space<vmem>>, vector<16x128xf32>
      %35 = arith.addf %34, %24 : vector<16x128xf32>
      %c0_19 = arith.constant 0 : index
      %c0_20 = arith.constant 0 : index
      %36 = vector.load %arg8[%c0_19, %c0_20] : memref<16x128xf32, #tpu.memory_space<vmem>>, vector<16x128xf32>
      tpu.vector_store %arg8[%c0_19, %c0_20], %35 {strides = array<i32>} : memref<16x128xf32, #tpu.memory_space<vmem>>, vector<16x128xf32>,
    } else {
    }
    %c0_i32_15 = arith.constant 0 : i32
    %31 = arith.cmpi eq, %arg1, %c0_i32_15 : i32
    %32 = arith.extui %31 : i1 to i32
    %c0_i32_16 = arith.constant 0 : i32
    %33 = arith.cmpi ne, %32, %c0_i32_16 : i32
    scf.if %33 {
      %c0_17 = arith.constant 0 : index
      %c0_18 = arith.constant 0 : index
      %34 = vector.load %arg8[%c0_17, %c0_18] : memref<16x128xf32, #tpu.memory_space<vmem>>, vector<16x128xf32>
      %c0_19 = arith.constant 0 : index
      %c0_20 = arith.constant 0 : index
      %35 = vector.load %arg6[%c0_19, %c0_20] : memref<1x128xf32, #tpu.memory_space<vmem>>, vector<1x128xf32>
      %36 = vector.broadcast %35 : vector<1x128xf32> to vector<16x128xf32>
      %37 = arith.addf %34, %36 : vector<16x128xf32>
      %c0_21 = arith.constant 0 : index
      %c0_22 = arith.constant 0 : index
      %38 = vector.load %arg7[%c0_21, %c0_22] : memref<16x128xf32, #tpu.memory_space<vmem>>, vector<16x128xf32>
      tpu.vector_store %arg7[%c0_21, %c0_22], %37 {strides = array<i32>} : memref<16x128xf32, #tpu.memory_space<vmem>>, vector<16x128xf32>,
    } else {
    }
    return
  }
  func.func @transform_0(%arg0: i32, %arg1: i32) -> (i32, i32) {
    %c0_i32 = arith.constant 0 : i32
    %c0_i32_0 = arith.constant 0 : i32
    return %arg0, %c0_i32 : i32, i32
  }
  func.func @transform_1(%arg0: i32, %arg1: i32) -> (i32, i32) {
    %c0_i32 = arith.constant 0 : i32
    %c0_i32_0 = arith.constant 0 : i32
    return %c0_i32, %arg1 : i32, i32
  }
  func.func @transform_2(%arg0: i32, %arg1: i32) -> (i32, i32) {
    %c0_i32 = arith.constant 0 : i32
    %c0_i32_0 = arith.constant 0 : i32
    return %c0_i32, %arg1 : i32, i32
  }
  func.func @transform_3(%arg0: i32, %arg1: i32) -> (i32, i32) {
    %c0_i32 = arith.constant 0 : i32
    %c0_i32_0 = arith.constant 0 : i32
    return %arg1, %c0_i32 : i32, i32
  }
  func.func @transform_4(%arg0: i32, %arg1: i32) -> (i32, i32) {
    %c0_i32 = arith.constant 0 : i32
    %c0_i32_0 = arith.constant 0 : i32
    %c0_i32_1 = arith.constant 0 : i32
    return %c0_i32, %c0_i32_0 : i32, i32
  }
  func.func @transform_5(%arg0: i32, %arg1: i32) -> (i32, i32) {
    %c0_i32 = arith.constant 0 : i32
    %c0_i32_0 = arith.constant 0 : i32
    return %arg0, %c0_i32 : i32, i32
  }
}

</mosaic_0001>

<bundles_post_ra>
// kernel: feed_forward.1
= control target key start
LH: loop header
LB: loop body
LE: loop exit
PB: predicated region body
PF: predicated region fallthrough
CT: control target
= control target key end

     0   :  { %s585_s1 = inlined_call_operand.vmem [shape: bf16[128,256], index: 1, kind: input, shape index: {}]   ;;  %s586_s0 = inlined_call_operand.vmem [shape: bf16[16,128], index: 0, kind: input, shape index: {}]   ;;  %s587_s4 = inlined_call_operand.vmem [shape: f32[1,128], index: 4, kind: input, shape index: {}]   ;;  %s588_s3 = inlined_call_operand.vmem [shape: bf16[128,128], index: 3, kind: input, shape index: {}]   ;;  %s589_s2 = inlined_call_operand.vmem [shape: f32[1,256], index: 2, kind: input, shape index: {}]   ;;  %s590_s5 = inlined_call_operand.vmem [shape: f32[16,128], index: 5, kind: output, shape index: {}]  }
   0x1   :  { %v405_v0 = vld [vmem:[%s585_s1 + $0x74] sm:$0xf]  ;;  %v354_v1 = vld [vmem:[%s585_s1 + $0x78] sm:$0xf0]  ;;  %v403_v2 = vld [vmem:[%s585_s1 + $0x64] sm:$0xf] }
   0x2   :  { %v357_v3 = vor.u32 %v405_v0, %v354_v1  ;;  %v346_v4 = vld [vmem:[%s585_s1 + $0x68] sm:$0xf0]  ;;  %v352_v5 = vld [vmem:[%s585_s1 + $0x70] sm:$0xf]  ;;  %v401_v7 = vld [vmem:[%s585_s1 + $0x54] sm:$0xf] }
   0x3   :  { %v349_v6 = vor.u32 %v403_v2, %v346_v4  ;;  %v406_v8 = vld [vmem:[%s585_s1 + $0x74] sm:$0xf0]  ;;  %v338_v9 = vld [vmem:[%s585_s1 + $0x58] sm:$0xf0]  ;;  %v344_v11 = vld [vmem:[%s585_s1 + $0x60] sm:$0xf] }
   0x4   :  { %144 = vmatpush.bf16.msra.mxu1 %v357_v3  ;;  %v353_v10 = vor.u32 %v406_v8, %v352_v5  ;;  %v404_v12 = vld [vmem:[%s585_s1 + $0x64] sm:$0xf0]  ;;  %v341_v14 = vor.u32 %v401_v7, %v338_v9  ;;  %v336_v15 = vld [vmem:[%s585_s1 + $0x50] sm:$0xf]  ;;  %v402_v16 = vld [vmem:[%s585_s1 + $0x54] sm:$0xf0] }
   0x5   :  { %v345_v13 = vor.u32 %v404_v12, %v344_v11  ;;  %v399_v17 = vld [vmem:[%s585_s1 + $0x44] sm:$0xf]  ;;  %v330_v18 = vld [vmem:[%s585_s1 + $0x48] sm:$0xf0]  ;;  %v337_v19 = vor.u32 %v402_v16, %v336_v15  ;;  %v328_v21 = vld [vmem:[%s585_s1 + $0x40] sm:$0xf] }
   0x6   :  { %130 = vmatpush.bf16.msra.mxu0 %v353_v10  ;;  %v333_v20 = vor.u32 %v399_v17, %v330_v18  ;;  %v400_v22 = vld [vmem:[%s585_s1 + $0x44] sm:$0xf0]  ;;  %v397_v23 = vld [vmem:[%s585_s1 + $0x34] sm:$0xf]  ;;  %v322_v24 = vld [vmem:[%s585_s1 + $0x38] sm:$0xf0] }
   0x7   :  { %v329_v25 = vor.u32 %v400_v22, %v328_v21  ;;  %v325_v26 = vor.u32 %v397_v23, %v322_v24  ;;  %v320_v27 = vld [vmem:[%s585_s1 + $0x30] sm:$0xf]  ;;  %v398_v28 = vld [vmem:[%s585_s1 + $0x34] sm:$0xf0]  ;;  %v395_v29 = vld [vmem:[%s585_s1 + $0x24] sm:$0xf] }
   0x8   :  { %145 = vmatpush.bf16.msra.mxu1 %v349_v6  ;;  %v314_v30 = vld [vmem:[%s585_s1 + $0x28] sm:$0xf0]  ;;  %v321_v31 = vor.u32 %v398_v28, %v320_v27  ;;  %v312_v33 = vld [vmem:[%s585_s1 + $0x20] sm:$0xf]  ;;  %v396_v34 = vld [vmem:[%s585_s1 + $0x24] sm:$0xf0] }
   0x9   :  { %v317_v32 = vor.u32 %v395_v29, %v314_v30  ;;  %v393_v35 = vld [vmem:[%s585_s1 + $0x14] sm:$0xf]  ;;  %v306_v36 = vld [vmem:[%s585_s1 + $0x18] sm:$0xf0]  ;;  %v313_v37 = vor.u32 %v396_v34, %v312_v33  ;;  %v304_v39 = vld [vmem:[%s585_s1 + $0x10] sm:$0xf] }
   0xa   :  { %131 = vmatpush.bf16.msra.mxu0 %v345_v13  ;;  %v309_v38 = vor.u32 %v393_v35, %v306_v36  ;;  %v394_v40 = vld [vmem:[%s585_s1 + $0x14] sm:$0xf0]  ;;  %v391_v41 = vld [vmem:[%s585_s1 + $0x4] sm:$0xf]  ;;  %v298_v42 = vld [vmem:[%s585_s1 + $0x8] sm:$0xf0] }
   0xb   :  { %v305_v43 = vor.u32 %v394_v40, %v304_v39  ;;  %v301_v44 = vor.u32 %v391_v41, %v298_v42  ;;  %v296_v45 = vld [vmem:[%s585_s1] sm:$0xf]  ;;  %v392_v46 = vld [vmem:[%s585_s1 + $0x4] sm:$0xf0]  ;;  %v414_v49 = vld [vmem:[%s588_s3 + $0x38] sm:$0xff] }
   0xc   :  { %146 = vmatpush.bf16.msra.mxu1 %v341_v14  ;;  %v390_v47 = vld [vmem:[%s586_s0] sm:$0xff]  ;;  %v297_v48 = vor.u32 %v392_v46, %v296_v45  ;;  %243 = vmatpush.bf16.msra.mxu2 %v414_v49  ;;  %v413_v50 = vld [vmem:[%s588_s3 + $0x30] sm:$0xff]  ;;  %v412_v51 = vld [vmem:[%s588_s3 + $0x28] sm:$0xff] }
   0xd   :  { %v411_v52 = vld [vmem:[%s588_s3 + $0x20] sm:$0xff]  ;;  %v410_v53 = vld [vmem:[%s588_s3 + $0x18] sm:$0xff]  ;;  %v409_v54 = vld [vmem:[%s588_s3 + $0x10] sm:$0xff] }
   0xe   :  { %132 = vmatpush.bf16.msra.mxu0 %v337_v19  ;;  %v38_v55 = vld [vmem:[%s589_s2] sm:$0x3]  ;;  %v408_v56 = vld [vmem:[%s588_s3 + $0x8] sm:$0xff] }
   0xf   :  { %v41_v57 = vperm.slane %v38_v55, 1  ;;  %v407_v58 = vld [vmem:[%s588_s3] sm:$0xff]  ;;  %v40_v11 = vperm.slane %v38_v55, 0 }
  0x10   :  { %147 = vmatpush.bf16.msra.mxu1 %v333_v20  ;;  %244 = vmatpush.bf16.msra.mxu2 %v413_v50 }
  0x12   :  { %133 = vmatpush.bf16.msra.mxu0 %v329_v25  ;;  %v415_v25 = vld [vmem:[%s587_s4] ss:$0 sm:$0xff] }
  0x14   :  { %148 = vmatpush.bf16.msra.mxu1 %v325_v26  ;;  %245 = vmatpush.bf16.msra.mxu2 %v412_v51 }
  0x16   :  { %134 = vmatpush.bf16.msra.mxu0 %v321_v31 }
  0x18   :  { %149 = vmatpush.bf16.msra.mxu1 %v317_v32  ;;  %246 = vmatpush.bf16.msra.mxu2 %v411_v52 }
  0x1a   :  { %135 = vmatpush.bf16.msra.mxu0 %v313_v37 }
  0x1c   :  { %150 = vmatpush.bf16.msra.mxu1 %v309_v38  ;;  %247 = vmatpush.bf16.msra.mxu2 %v410_v53 }
  0x1e   :  { %136 = vmatpush.bf16.msra.mxu0 %v305_v43 }
  0x20   :  { %151 = vmatpush.bf16.msra.mxu1 %v301_v44  ;;  %248 = vmatpush.bf16.msra.mxu2 %v409_v54 }
  0x22   :  { %137 = vmatpush.bf16.msra.mxu0 %v297_v48 }
  0x23   :  { %152 = vmatmul.bf16.vlgmr.msra.gmra.mxu1 %v390_v47 }
  0x24   :  { %249 = vmatpush.bf16.msra.mxu2 %v408_v56 }
  0x25   :  { %138 = vmatmul.bf16.vlgmr.msra.gmra.mxu0 %v390_v47 }
  0x28   :  { %250 = vmatpush.bf16.msra.mxu2 %v407_v58 }
  0xa0   :  { %v153_v59 = vpop.f32.mrf.mxu1 }
  0xa1   :  { %v154_v60 = vadd.f32 %v153_v59, %v41_v57 }
  0xa2   :  { %v139_v7 = vpop.f32.mrf.mxu0 }
  0xa3   :  { %v160_v61 = vmul.f32 0.044715, %v154_v60  ;;  %v158_v13 = vmul.f32 0.5, %v154_v60  ;;  %v140_v16 = vadd.f32 %v139_v7, %v40_v11 }
  0xa5   :  { %v162_v62 = vmul.f32 %v160_v61, %v154_v60 }
  0xa7   :  { %v164_v63 = vmul.f32 %v162_v62, %v154_v60 }
  0xa8   :  { %v155_v0 = vpop.f32.mrf.mxu1 }
  0xa9   :  { %v156_v1 = vadd.f32 %v155_v0, %v41_v57  ;;  %v166_v2 = vadd.f32 %v164_v63, %v154_v60 }
  0xaa   :  { %v141_v15 = vpop.f32.mrf.mxu0 }
  0xab   :  { %v161_v3 = vmul.f32 0.044715, %v156_v1  ;;  %v168_v4 = vmul.f32 0.7978846, %v166_v2  ;;  %v159_v18 = vmul.f32 0.5, %v156_v1  ;;  %v142_v20 = vadd.f32 %v141_v15, %v40_v11 }
  0xad   :  { %v163_v5 = vmul.f32 %v161_v3, %v156_v1  ;;  %416 = vtanh.f32 %v168_v4 }
  0xaf   :  { %v165_v6 = vmul.f32 %v163_v5, %v156_v1 }
  0xb1   :  { %v167_v8 = vadd.f32 %v165_v6, %v156_v1 }
  0xb3   :  { %v169_v9 = vmul.f32 0.7978846, %v167_v8  ;;  %v417_v10 = vpop.eup %416 }
  0xb4   :  { %v172_v12 = vadd.f32 1.0, %v417_v10 }
  0xb5   :  { %418 = vtanh.f32 %v169_v9 }
  0xb6   :  { %v174_v17 = vmul.f32 %v172_v12, %v158_v13 }
  0xb8   :  { %v176_v22 = vmul.f32 %v174_v17, %v140_v16 }
  0xbb   :  { %v419_v14 = vpop.eup %418 }
  0xbc   :  { %v173_v19 = vadd.f32 1.0, %v419_v14 }
  0xbe   :  { %v175_v21 = vmul.f32 %v173_v19, %v159_v18 }
  0xc0   :  { %v177_v23 = vmul.f32 %v175_v21, %v142_v20 }
  0xc2   :  { %v178_v24 = vpack.c.bf16 %v177_v23, %v176_v22 }
  0xc4   :  { %251 = vmatmul.bf16.vlgmr.msra.gmra.mxu2 %v178_v24 }
 0x147   :  { %v252_v26 = vpop.f32.mrf.mxu2 }
 0x148   :  { %v282_v27 = vadd.f32 %v415_v25, %v252_v26 }
 0x14a   :  { %284 = vst [vmem:[%s590_s5] sm:$0xff] %v282_v27 }
 0x14f   :  { %v254_v28 = vpop.f32.mrf.mxu2 }
 0x150   :  { %v283_v29 = vadd.f32 %v415_v25, %v254_v28 }
 0x152   :  { %285 = vst [vmem:[%s590_s5 + $0x8] sm:$0xff] %v283_v29 }

</bundles_post_ra>
